<compile_context>
chip_gen: v7x
topology: tpu7x:2x2x1
jax: 0.10.0
libtpu: 0.0.40
codegen_flags: <defaults>
</compile_context>

<pallas_src>
import functools

import jax
import jax.numpy as jnp
from jax.experimental import pallas as pl
from jax.experimental.pallas import tpu as pltpu


def _round_up(n, m):
    return ((n + m - 1) // m) * m


def _dann_mlp_kernel(x_ref,
                     w1_ref, b1_ref,
                     w2_ref, b2_ref,
                     wo_ref, bo_ref,
                     out_ref, pre2_ref=None):
    """Fused 3-layer Dale MLP forward on one batch tile (one MXU matmul/layer)."""
    cdt = w1_ref.dtype                       # bf16 compute dtype (weights pre-fused)
    x = x_ref[...].astype(cdt)               # f32 read from HBM, cast in-kernel

    pre1 = jnp.dot(x, w1_ref[...], preferred_element_type=jnp.float32) + b1_ref[...]
    h1 = jnp.maximum(pre1, 0.0).astype(cdt)                    # nn.ReLU (f32), cast for MXU

    pre2 = jnp.dot(h1, w2_ref[...], preferred_element_type=jnp.float32) + b2_ref[...]
    if pre2_ref is not None:
        pre2_ref[...] = pre2.astype(pre2_ref.dtype)            # returned pre_activation
    h2 = jnp.maximum(pre2, 0.0).astype(cdt)                    # nn.ReLU

    out_ref[...] = (jnp.dot(h2, wo_ref[...], preferred_element_type=jnp.float32)
                    + bo_ref[...]).astype(out_ref.dtype)


def deep_dense_dann_forward(x, params, *, batch_tile=512,
                            compute_dtype=jnp.bfloat16,
                            out_dtype=jnp.float32,
                            pre2_dtype=jnp.bfloat16,
                            return_pre2=True,
                            return_padded=False):
    """params: dict of layer dicts {'Wex','Wix','Wei','b'} in PyTorch shapes."""
    B, input_size = x.shape
    hidden_size = params["fc1"]["Wex"].shape[0]
    output_size = params["fc_output"]["Wex"].shape[0]

    # Lane-dense padded output feature dims (multiples of 128).
    hid_p = _round_up(hidden_size, 128)
    out_p = _round_up(output_size, 128)

    # Batch tiling: bf16 activations pack 16 rows/sublane group -> tiles of 16.
    bt = max(16, _round_up(min(batch_tile, B), 16))
    if pl.cdiv(B, bt) == 1 and B > 256:
        # Ensure >=2 grid steps so the "parallel" axis shards across v7x's two
        # TensorCores (free on single-TC v5e/v6e).
        bt = max(16, _round_up(-(-B // 2), 16))
    B_pad = max(B, bt)                 # pad batch only for sub-tile batches
    x_in = x if B_pad == B else jnp.pad(x, ((0, B_pad - B), (0, 0)))
    grid_b = pl.cdiv(B_pad, bt)        # ragged last tile handled by Pallas (masked writes)

    def fuse(layer, in_pad, out_pad):
        p = params[layer]
        # Effective Dale weight, pre-transposed: W_eff = Wex.T - Wix.T @ Wei.T
        # (f32 subtraction first so E/I cancellation is exact, then cast).
        w = (p["Wex"].T.astype(jnp.float32)
             - p["Wix"].T.astype(jnp.float32) @ p["Wei"].T.astype(jnp.float32))
        w = jnp.pad(w, ((0, in_pad - w.shape[0]), (0, out_pad - w.shape[1])))
        b = jnp.pad(p["b"].astype(jnp.float32).reshape(1, -1),
                    ((0, 0), (0, out_pad - p["b"].shape[0])))
        return w.astype(compute_dtype), b          # bias stays f32 (added to f32 acc)

    w1, b1 = fuse("fc1", input_size, hid_p)        # x unpadded -> K1 == input_size
    w2, b2 = fuse("fc2", hid_p, hid_p)
    wo, bo = fuse("fc_output", hid_p, out_p)

    # Grid-invariant operands: single-buffered (no overlap benefit, halves VMEM).
    resident = lambda a: pl.BlockSpec(a.shape, lambda i: (0, 0),
                                      pipeline_mode=pl.Buffered(1))
    in_specs = [pl.BlockSpec((bt, input_size), lambda i: (i, 0)),
                resident(w1), resident(b1), resident(w2), resident(b2),
                resident(wo), resident(bo)]

    out_shapes = [jax.ShapeDtypeStruct((B_pad, out_p), out_dtype)]
    out_specs = [pl.BlockSpec((bt, out_p), lambda i: (i, 0))]
    if return_pre2:
        out_shapes.append(jax.ShapeDtypeStruct((B_pad, hid_p), pre2_dtype))
        out_specs.append(pl.BlockSpec((bt, hid_p), lambda i: (i, 0)))

    # Explicit VMEM budget: weights x1 (Buffered(1)) + double-buffered x/out
    # tiles + f32 temporaries + headroom for Mosaic internal scratch.
    nbytes = lambda a: a.size * a.dtype.itemsize
    itemsz = lambda d: jnp.dtype(d).itemsize
    weight_bytes = sum(nbytes(a) for a in (w1, b1, w2, b2, wo, bo))
    io_bytes = 2 * bt * input_size * itemsz(x.dtype) + 2 * bt * out_p * itemsz(out_dtype)
    if return_pre2:
        io_bytes += 2 * bt * hid_p * itemsz(pre2_dtype)
    temp_bytes = 6 * bt * hid_p * 4
    vmem_limit = int(min(max(int(1.5 * (weight_bytes + io_bytes + temp_bytes)) + (8 << 20),
                             32 << 20), 100 << 20))

    rows = grid_b * bt
    flops = 2 * rows * (input_size * hid_p + hid_p * hid_p + hid_p * out_p)
    bytes_accessed = (B_pad * input_size * itemsz(x.dtype) + weight_bytes
                      + rows * out_p * itemsz(out_dtype)
                      + (rows * hid_p * itemsz(pre2_dtype) if return_pre2 else 0))

    outs = pl.pallas_call(
        _dann_mlp_kernel,
        out_shape=tuple(out_shapes) if return_pre2 else out_shapes[0],
        grid=(grid_b,),
        in_specs=in_specs,
        out_specs=tuple(out_specs) if return_pre2 else out_specs[0],
        compiler_params=pltpu.CompilerParams(
            dimension_semantics=("parallel",),
            vmem_limit_bytes=vmem_limit),
        cost_estimate=pl.CostEstimate(
            flops=flops, transcendentals=0, bytes_accessed=bytes_accessed),
    )(x_in, w1, b1, w2, b2, wo, bo)

    if return_pre2:
        out, pre2 = outs
    else:
        out, pre2 = outs, None

    if not return_padded:
        # Only slice when padding actually happened (no-op pass otherwise).
        if out.shape != (B, output_size):
            out = out[:B, :output_size]
        if pre2 is not None and pre2.shape != (B, hidden_size):
            pre2 = pre2[:B, :hidden_size]

    return (out, pre2) if return_pre2 else out


def init_params(key, input_size, hidden_size, output_size):
    """Deterministic synthetic params respecting Dale sign constraints (>=0)."""
    def ei_layer(key, n_in, n_out):
        ni = max(1, int(n_out * 0.1))
        k1, k2, k3 = jax.random.split(key, 3)
        scale = 1.0 / jnp.sqrt(jnp.float32(n_in))
        Wex = jnp.abs(jax.random.normal(k1, (n_out, n_in), jnp.float32)) * scale
        Wix = jnp.abs(jax.random.normal(k2, (ni, n_in), jnp.float32)) * scale
        Wei = jnp.abs(jax.random.normal(k3, (n_out, ni), jnp.float32)) / jnp.float32(ni)
        b = jnp.zeros((n_out,), jnp.float32)
        return {"Wex": Wex, "Wix": Wix, "Wei": Wei, "b": b}

    k1, k2, k3 = jax.random.split(key, 3)
    return {
        "fc1": ei_layer(k1, input_size, hidden_size),
        "fc2": ei_layer(k2, hidden_size, hidden_size),
        "fc_output": ei_layer(k3, hidden_size, output_size),
    }


def _reference_forward(x, params):
    def ei(h, p):
        return h @ p["Wex"].T - (h @ p["Wix"].T) @ p["Wei"].T + p["b"]
    pre1 = ei(x, params["fc1"])
    h1 = jnp.maximum(pre1, 0.0)
    pre2 = ei(h1, params["fc2"])
    h2 = jnp.maximum(pre2, 0.0)
    out = ei(h2, params["fc_output"])
    return out, pre2


if __name__ == "__main__":
    batch, input_size, hidden_size, output_size = 8, 32, 32, 10

    key = jax.random.PRNGKey(0)
    kx, kp = jax.random.split(key)
    x = jax.random.normal(kx, (batch, input_size), jnp.float32)
    params = init_params(kp, input_size, hidden_size, output_size)

    fwd = jax.jit(functools.partial(deep_dense_dann_forward, batch_tile=512))
    out, pre2 = fwd(x, params)
    jax.block_until_ready((out, pre2))

    ref_out, ref_pre2 = _reference_forward(x, params)
    assert out.shape == (batch, output_size) and pre2.shape == (batch, hidden_size)
    # bf16 matmul inputs / bf16 pre2 storage (f32 accumulation) -> loose tol vs f32 ref.
    assert jnp.allclose(out, ref_out, atol=5e-2, rtol=5e-2)
    assert jnp.allclose(pre2.astype(jnp.float32), ref_pre2, atol=5e-2, rtol=5e-2)

    print("KERNEL_OK")
</pallas_src>

<mosaic_0001>
module attributes {stable_mosaic.version = 11 : i64} {
  func.func @_dann_mlp_kernel(%arg0: i32, %arg1: memref<16x32xf32, #tpu.memory_space<vmem>>, %arg2: memref<32x128xbf16, #tpu.memory_space<vmem>>, %arg3: memref<1x128xf32, #tpu.memory_space<vmem>>, %arg4: memref<128x128xbf16, #tpu.memory_space<vmem>>, %arg5: memref<1x128xf32, #tpu.memory_space<vmem>>, %arg6: memref<128x128xbf16, #tpu.memory_space<vmem>>, %arg7: memref<1x128xf32, #tpu.memory_space<vmem>>, %arg8: memref<16x128xf32, #tpu.memory_space<vmem>>, %arg9: memref<16x128xbf16, #tpu.memory_space<vmem>>) attributes {dimension_semantics = [#tpu.dimension_semantics<parallel>], iteration_bounds = array<i64: 1>, scalar_prefetch = 0 : i64, scratch_operands = 0 : i64, tpu.core_type = #tpu.core_type<tc>, window_params = [{transform_indices = @transform_0, window_bounds = array<i64: 16, 32>}, {pipeline_mode = #tpu.pipeline_mode<synchronous>, transform_indices = @transform_1, window_bounds = array<i64: 32, 128>}, {pipeline_mode = #tpu.pipeline_mode<synchronous>, transform_indices = @transform_2, window_bounds = array<i64: 1, 128>}, {pipeline_mode = #tpu.pipeline_mode<synchronous>, transform_indices = @transform_3, window_bounds = array<i64: 128, 128>}, {pipeline_mode = #tpu.pipeline_mode<synchronous>, transform_indices = @transform_4, window_bounds = array<i64: 1, 128>}, {pipeline_mode = #tpu.pipeline_mode<synchronous>, transform_indices = @transform_5, window_bounds = array<i64: 128, 128>}, {pipeline_mode = #tpu.pipeline_mode<synchronous>, transform_indices = @transform_6, window_bounds = array<i64: 1, 128>}, {transform_indices = @transform_7, window_bounds = array<i64: 16, 128>}, {transform_indices = @transform_8, window_bounds = array<i64: 16, 128>}]} {
    %c0 = arith.constant 0 : index
    %c0_0 = arith.constant 0 : index
    %0 = vector.load %arg1[%c0, %c0_0] : memref<16x32xf32, #tpu.memory_space<vmem>>, vector<16x32xf32>
    %1 = arith.truncf %0 : vector<16x32xf32> to vector<16x32xbf16>
    %c0_1 = arith.constant 0 : index
    %c0_2 = arith.constant 0 : index
    %2 = vector.load %arg2[%c0_1, %c0_2] : memref<32x128xbf16, #tpu.memory_space<vmem>>, vector<32x128xbf16>
    %cst = arith.constant dense<0.000000e+00> : vector<16x128xf32>
    %3 = tpu.matmul %1, %2, %cst {dimension_numbers = #tpu.dot_dimension_numbers<[1], [0], [0], [1], [0, 0, 1, 1], [], []>} : vector<16x32xbf16>, vector<32x128xbf16>, vector<16x128xf32> -> vector<16x128xf32>
    %c0_3 = arith.constant 0 : index
    %c0_4 = arith.constant 0 : index
    %4 = vector.load %arg3[%c0_3, %c0_4] : memref<1x128xf32, #tpu.memory_space<vmem>>, vector<1x128xf32>
    %5 = vector.broadcast %4 : vector<1x128xf32> to vector<16x128xf32>
    %6 = arith.addf %3, %5 : vector<16x128xf32>
    %cst_5 = arith.constant 0.000000e+00 : f32
    %7 = vector.broadcast %cst_5 : f32 to vector<16x128xf32>
    %8 = arith.maximumf %6, %7 : vector<16x128xf32>
    %9 = arith.truncf %8 : vector<16x128xf32> to vector<16x128xbf16>
    %c0_6 = arith.constant 0 : index
    %c0_7 = arith.constant 0 : index
    %10 = vector.load %arg4[%c0_6, %c0_7] : memref<128x128xbf16, #tpu.memory_space<vmem>>, vector<128x128xbf16>
    %cst_8 = arith.constant dense<0.000000e+00> : vector<16x128xf32>
    %11 = tpu.matmul %9, %10, %cst_8 {dimension_numbers = #tpu.dot_dimension_numbers<[1], [0], [0], [1], [0, 0, 1, 1], [], []>} : vector<16x128xbf16>, vector<128x128xbf16>, vector<16x128xf32> -> vector<16x128xf32>
    %c0_9 = arith.constant 0 : index
    %c0_10 = arith.constant 0 : index
    %12 = vector.load %arg5[%c0_9, %c0_10] : memref<1x128xf32, #tpu.memory_space<vmem>>, vector<1x128xf32>
    %13 = vector.broadcast %12 : vector<1x128xf32> to vector<16x128xf32>
    %14 = arith.addf %11, %13 : vector<16x128xf32>
    %15 = arith.truncf %14 : vector<16x128xf32> to vector<16x128xbf16>
    %c0_11 = arith.constant 0 : index
    %c0_12 = arith.constant 0 : index
    %16 = vector.load %arg9[%c0_11, %c0_12] : memref<16x128xbf16, #tpu.memory_space<vmem>>, vector<16x128xbf16>
    tpu.vector_store %arg9[%c0_11, %c0_12], %15 {strides = array<i32>} : memref<16x128xbf16, #tpu.memory_space<vmem>>, vector<16x128xbf16>,
    %cst_13 = arith.constant 0.000000e+00 : f32
    %17 = vector.broadcast %cst_13 : f32 to vector<16x128xf32>
    %18 = arith.maximumf %14, %17 : vector<16x128xf32>
    %19 = arith.truncf %18 : vector<16x128xf32> to vector<16x128xbf16>
    %c0_14 = arith.constant 0 : index
    %c0_15 = arith.constant 0 : index
    %20 = vector.load %arg6[%c0_14, %c0_15] : memref<128x128xbf16, #tpu.memory_space<vmem>>, vector<128x128xbf16>
    %cst_16 = arith.constant dense<0.000000e+00> : vector<16x128xf32>
    %21 = tpu.matmul %19, %20, %cst_16 {dimension_numbers = #tpu.dot_dimension_numbers<[1], [0], [0], [1], [0, 0, 1, 1], [], []>} : vector<16x128xbf16>, vector<128x128xbf16>, vector<16x128xf32> -> vector<16x128xf32>
    %c0_17 = arith.constant 0 : index
    %c0_18 = arith.constant 0 : index
    %22 = vector.load %arg7[%c0_17, %c0_18] : memref<1x128xf32, #tpu.memory_space<vmem>>, vector<1x128xf32>
    %23 = vector.broadcast %22 : vector<1x128xf32> to vector<16x128xf32>
    %24 = arith.addf %21, %23 : vector<16x128xf32>
    %c0_19 = arith.constant 0 : index
    %c0_20 = arith.constant 0 : index
    %25 = vector.load %arg8[%c0_19, %c0_20] : memref<16x128xf32, #tpu.memory_space<vmem>>, vector<16x128xf32>
    tpu.vector_store %arg8[%c0_19, %c0_20], %24 {strides = array<i32>} : memref<16x128xf32, #tpu.memory_space<vmem>>, vector<16x128xf32>,
    return
  }
  func.func @transform_0(%arg0: i32) -> (i32, i32) {
    %c0_i32 = arith.constant 0 : i32
    %c0_i32_0 = arith.constant 0 : i32
    return %arg0, %c0_i32 : i32, i32
  }
  func.func @transform_1(%arg0: i32) -> (i32, i32) {
    %c0_i32 = arith.constant 0 : i32
    %c0_i32_0 = arith.constant 0 : i32
    %c0_i32_1 = arith.constant 0 : i32
    return %c0_i32, %c0_i32_0 : i32, i32
  }
  func.func @transform_2(%arg0: i32) -> (i32, i32) {
    %c0_i32 = arith.constant 0 : i32
    %c0_i32_0 = arith.constant 0 : i32
    %c0_i32_1 = arith.constant 0 : i32
    return %c0_i32, %c0_i32_0 : i32, i32
  }
  func.func @transform_3(%arg0: i32) -> (i32, i32) {
    %c0_i32 = arith.constant 0 : i32
    %c0_i32_0 = arith.constant 0 : i32
    %c0_i32_1 = arith.constant 0 : i32
    return %c0_i32, %c0_i32_0 : i32, i32
  }
  func.func @transform_4(%arg0: i32) -> (i32, i32) {
    %c0_i32 = arith.constant 0 : i32
    %c0_i32_0 = arith.constant 0 : i32
    %c0_i32_1 = arith.constant 0 : i32
    return %c0_i32, %c0_i32_0 : i32, i32
  }
  func.func @transform_5(%arg0: i32) -> (i32, i32) {
    %c0_i32 = arith.constant 0 : i32
    %c0_i32_0 = arith.constant 0 : i32
    %c0_i32_1 = arith.constant 0 : i32
    return %c0_i32, %c0_i32_0 : i32, i32
  }
  func.func @transform_6(%arg0: i32) -> (i32, i32) {
    %c0_i32 = arith.constant 0 : i32
    %c0_i32_0 = arith.constant 0 : i32
    %c0_i32_1 = arith.constant 0 : i32
    return %c0_i32, %c0_i32_0 : i32, i32
  }
  func.func @transform_7(%arg0: i32) -> (i32, i32) {
    %c0_i32 = arith.constant 0 : i32
    %c0_i32_0 = arith.constant 0 : i32
    return %arg0, %c0_i32 : i32, i32
  }
  func.func @transform_8(%arg0: i32) -> (i32, i32) {
    %c0_i32 = arith.constant 0 : i32
    %c0_i32_0 = arith.constant 0 : i32
    return %arg0, %c0_i32 : i32, i32
  }
}

</mosaic_0001>

<bundles_post_ra>
// kernel: deep_dense_dann_forward.1
= control target key start
LH: loop header
LB: loop body
LE: loop exit
PB: predicated region body
PF: predicated region fallthrough
CT: control target
= control target key end

     0   :  { %v470_v0 = vmov 0.0   ;;  %vm471_vm0 = vmmov 0   ;;  %vm55_vm1 = vcmask 261120   ;;  %s619_s1 = inlined_call_operand.vmem [shape: bf16[32,128], index: 1, kind: input, shape index: {}]   ;;  %s620_s0 = inlined_call_operand.vmem [shape: f32[16,32], index: 0, kind: input, shape index: {}]   ;;  %s621_s3 = inlined_call_operand.vmem [shape: bf16[128,128], index: 3, kind: input, shape index: {}]   ;;  %s622_s5 = inlined_call_operand.vmem [shape: bf16[128,128], index: 5, kind: input, shape index: {}]   ;;  %s623_s2 = inlined_call_operand.vmem [shape: f32[1,128], index: 2, kind: input, shape index: {}]   ;;  %s624_s4 = inlined_call_operand.vmem [shape: f32[1,128], index: 4, kind: input, shape index: {}]   ;;  %s625_s8 = inlined_call_operand.vmem [shape: bf16[16,128], index: 8, kind: output, shape index: {1}]   ;;  %s626_s6 = inlined_call_operand.vmem [shape: f32[1,128], index: 6, kind: input, shape index: {}]   ;;  %s627_s7 = inlined_call_operand.vmem [shape: f32[16,128], index: 7, kind: output, shape index: {0}]  }
   0x1   :  { %402 = vmatprep.subr.bf16.mxu0 %v470_v0  ;;  %v452_v1 = vld [vmem:[%s619_s1] sm:$0xff]   ;;  %406 = vmatprep.mubr.msk.bf16.mxu0 %vm471_vm0, %v470_v0  ;;  %v453_v2 = vld [vmem:[%s619_s1 + $0x8] sm:$0xff]   ;;  %v456_v8 = vld [vmem:[%s621_s3 + $0x10] sm:$0xff]  }
   0x2   :  { %410 = vmatprep.subr.bf16.mxu1 %v470_v0  ;;  %426 = vmatprep.mubr.msk.bf16.mxu1 %vm471_vm0, %v470_v0  ;;  %v29_v3 = vld [vmem:[%s620_s0] sm:$0xff]  ;;  %v30_v4 = vld [vmem:[%s620_s0 + $0x8] sm:$0xff]  ;;  %v457_v9 = vld [vmem:[%s621_s3 + $0x18] sm:$0xff]  }
   0x3   :  { %403 = vmatpush3.bf16.msra.mxu0 %v452_v1  ;;  %v454_v5 = vld [vmem:[%s621_s3] sm:$0xff]   ;;  %v31_v6 = vpack.c.bf16 %v30_v4, %v29_v3  ;;  %v455_v7 = vld [vmem:[%s621_s3 + $0x8] sm:$0xff]   ;;  %v460_v12 = vld [vmem:[%s621_s3 + $0x30] sm:$0xff]  }
   0x4   :  { %404 = vmatprep.subr.bf16.mxu0 %v470_v0  ;;  %411 = vmatpush3.bf16.msra.mxu1 %v454_v5  ;;  %v458_v10 = vld [vmem:[%s621_s3 + $0x20] sm:$0xff]   ;;  %v459_v11 = vld [vmem:[%s621_s3 + $0x28] sm:$0xff]   ;;  %v461_v13 = vld [vmem:[%s621_s3 + $0x38] sm:$0xff]  }
   0x5   :  { %412 = vmatprep.subr.bf16.mxu1 %v470_v0  ;;  %v462_v14 = vld [vmem:[%s622_s5] sm:$0xff]   ;;  %v463_v15 = vld [vmem:[%s622_s5 + $0x8] sm:$0xff]   ;;  %v464_v16 = vld [vmem:[%s622_s5 + $0x10] sm:$0xff]  }
   0x6   :  { %v465_v17 = vld [vmem:[%s622_s5 + $0x18] sm:$0xff]   ;;  %v466_v18 = vld [vmem:[%s622_s5 + $0x20] sm:$0xff]   ;;  %v467_v19 = vld [vmem:[%s622_s5 + $0x28] sm:$0xff]  }
   0x7   :  { %405 = vmatpush3.bf16.msra.mxu0 %v453_v2  ;;  %v350_v20 = vld [vmem:[%s623_s2] ss:$0 sm:$0xff]  ;;  %v468_v30 = vld [vmem:[%s622_s5 + $0x30] sm:$0xff]   ;;  %v469_v31 = vld [vmem:[%s622_s5 + $0x38] sm:$0xff]  }
   0x8   :  { %430 = vmatprep.subr.bf16.mxu0 %v470_v0  ;;  %413 = vmatpush3.bf16.msra.mxu1 %v455_v7  ;;  %v354_v32 = vld [vmem:[%s624_s4] ss:$0 sm:$0xff] }
   0x9   :  { %414 = vmatprep.subr.bf16.mxu1 %v470_v0  ;;  %v365_v43 = vld [vmem:[%s626_s6] ss:$0 sm:$0xff] }
   0xa   :  { %407 = vmatmul.mubr.msk.bf16.vlgmr.msra.gmra.mrb[0].mxu0 %vm55_vm1, %v31_v6 }
   0xb   :  { %446 = vmatprep.mubr.msk.bf16.mxu0 %vm471_vm0, %v470_v0  ;;  %431 = vmatpush3.bf16.msra.mxu0 %v462_v14 }
   0xc   :  { %415 = vmatpush3.bf16.msra.mxu1 %v456_v8  ;;  %432 = vmatprep.subr.bf16.mxu0 %v470_v0 }
   0xd   :  { %416 = vmatprep.subr.bf16.mxu1 %v470_v0 }
   0xf   :  { %433 = vmatpush3.bf16.msra.mxu0 %v463_v15 }
  0x10   :  { %417 = vmatpush3.bf16.msra.mxu1 %v457_v9  ;;  %434 = vmatprep.subr.bf16.mxu0 %v470_v0 }
  0x11   :  { %418 = vmatprep.subr.bf16.mxu1 %v470_v0 }
  0x13   :  { %435 = vmatpush3.bf16.msra.mxu0 %v464_v16 }
  0x14   :  { %419 = vmatpush3.bf16.msra.mxu1 %v458_v10  ;;  %436 = vmatprep.subr.bf16.mxu0 %v470_v0 }
  0x15   :  { %420 = vmatprep.subr.bf16.mxu1 %v470_v0 }
  0x17   :  { %437 = vmatpush3.bf16.msra.mxu0 %v465_v17 }
  0x18   :  { %421 = vmatpush3.bf16.msra.mxu1 %v459_v11  ;;  %438 = vmatprep.subr.bf16.mxu0 %v470_v0 }
  0x19   :  { %422 = vmatprep.subr.bf16.mxu1 %v470_v0 }
  0x1b   :  { %439 = vmatpush3.bf16.msra.mxu0 %v466_v18 }
  0x1c   :  { %423 = vmatpush3.bf16.msra.mxu1 %v460_v12  ;;  %440 = vmatprep.subr.bf16.mxu0 %v470_v0 }
  0x1d   :  { %424 = vmatprep.subr.bf16.mxu1 %v470_v0 }
  0x1f   :  { %441 = vmatpush3.bf16.msra.mxu0 %v467_v19 }
  0x20   :  { %425 = vmatpush3.bf16.msra.mxu1 %v461_v13  ;;  %442 = vmatprep.subr.bf16.mxu0 %v470_v0 }
  0x23   :  { %443 = vmatpush3.bf16.msra.mxu0 %v468_v30 }
  0x24   :  { %444 = vmatprep.subr.bf16.mxu0 %v470_v0 }
  0x27   :  { %445 = vmatpush3.bf16.msra.mxu0 %v469_v31 }
  0xdd   :  { %v93_v21 = vpop.f32.mrb[0].mxu0 }
  0xde   :  { %v94_v22 = vadd.f32 %v350_v20, %v93_v21  ;;  %v408_v23 = vpop.f32.mrb[1].mxu0 }
  0xdf   :  { %v96_v24 = vpop.f32.mrb[2].mxu0 }
  0xe0   :  { %v97_v25 = vadd.f32 %v350_v20, %v96_v24  ;;  %v409_v26 = vpop.f32.mrb[3].mxu0  ;;  %v100_v27 = vmax.f32 %v94_v22, 0.0 }
  0xe2   :  { %v101_v28 = vmax.f32 %v97_v25, 0.0 }
  0xe4   :  { %v102_v29 = vpack.c.bf16 %v101_v28, %v100_v27 }
  0xe6   :  { %427 = vmatmul.mubr.bf16.vlgmr.msra.gmra.mrb[0].mxu1 %v102_v29 }
 0x1b9   :  { %v208_v33 = vpop.f32.mrb[0].mxu1 }
 0x1ba   :  { %v209_v34 = vadd.f32 %v354_v32, %v208_v33  ;;  %v428_v35 = vpop.f32.mrb[1].mxu1 }
 0x1bb   :  { %v211_v36 = vpop.f32.mrb[2].mxu1 }
 0x1bc   :  { %v212_v37 = vadd.f32 %v354_v32, %v211_v36  ;;  %v429_v38 = vpop.f32.mrb[3].mxu1  ;;  %v225_v39 = vmax.f32 %v209_v34, 0.0 }
 0x1be   :  { %v379_v40 = vpack.c.bf16 %v212_v37, %v209_v34  ;;  %v226_v41 = vmax.f32 %v212_v37, 0.0 }
 0x1c0   :  { %380 = vst [vmem:[%s625_s8] sm:$0xff] %v379_v40   ;;  %v227_v42 = vpack.c.bf16 %v226_v41, %v225_v39 }
 0x1c2   :  { %447 = vmatmul.mubr.bf16.vlgmr.msra.gmra.mrb[4].mxu0 %v227_v42 }
 0x295   :  { %v333_v44 = vpop.f32.mrb[4].mxu0 }
 0x296   :  { %v334_v45 = vadd.f32 %v365_v43, %v333_v44  ;;  %v448_v46 = vpop.f32.mrb[5].mxu0 }
 0x297   :  { %v336_v47 = vpop.f32.mrb[6].mxu0 }
 0x298   :  { %340 = vst [vmem:[%s627_s7] sm:$0xff] %v334_v45  ;;  %v337_v48 = vadd.f32 %v365_v43, %v336_v47  ;;  %v449_v49 = vpop.f32.mrb[7].mxu0 }
 0x29a   :  { %341 = vst [vmem:[%s627_s7 + $0x8] sm:$0xff] %v337_v48 }

</bundles_post_ra>
